<compile_context>
chip_gen: v7x
topology: tpu7x:2x2x1
jax: 0.10.0
libtpu: 0.0.40
codegen_flags: <defaults>
</compile_context>

<pallas_src>
import jax
import jax.numpy as jnp
from jax import lax
from jax.experimental import pallas as pl
from jax.experimental.pallas import tpu as pltpu

EPS = 1e-8


def _agri_loss_kernel(x_ref, cgr_ref, m_ref, out_ref):
    # Native (T, F) inputs -> lane-dense (F, T): one f32 transpose each.
    x = jnp.transpose(x_ref[...].astype(jnp.float32))        # (F, T)
    cgr = jnp.transpose(cgr_ref[...].astype(jnp.float32))    # (F, T)
    m = m_ref[...]
    if m.dtype == jnp.bool_:
        um_tf = jnp.where(m, 0.0, 1.0)                        # 1.0 where NOT missing
    else:
        um_tf = jnp.where(m != 0, 0.0, 1.0)
    um = jnp.transpose(um_tf)                                 # (F, T) f32

    F, T = x.shape
    inv_n_total = 1.0 / float(F * T)

    # --- positivity_loss = mean(relu(-x) * ~mask) over all elements ---------
    positivity = jnp.sum(jnp.maximum(-x, 0.0) * um) * inv_n_total

    # --- smoothness_loss = mean(|x[:, 1:] - x[:, :-1]|) ----------------------
    # Circular lane roll (XLU): sum(|roll(x) - x|) over all lanes equals the
    # sum of adjacent |diffs| plus the wraparound term |x[:,0] - x[:,T-1]|,
    # for either roll direction.  The wrap term is recovered with lane-iota
    # masked reductions (VPU select + XLU reduce) — no single-lane slices.
    # (Assumes pltpu.roll is a logical circular shift over the full T extent.)
    rolled = pltpu.roll(x, shift=1, axis=1)
    diff_sum = jnp.sum(jnp.abs(rolled - x))
    lane = lax.broadcasted_iota(jnp.int32, (F, T), 1)
    first = jnp.sum(jnp.where(lane == 0, x, 0.0), axis=1, keepdims=True)     # (F, 1)
    last = jnp.sum(jnp.where(lane == T - 1, x, 0.0), axis=1, keepdims=True)  # (F, 1)
    wrap = jnp.sum(jnp.abs(first - last))
    smoothness = (diff_sum - wrap) * (1.0 / float((T - 1) * F))

    # --- cgr_scaled: global mean / unbiased std (torch.std correction=1) ----
    cgr_mean = jnp.sum(cgr) * inv_n_total
    cgr_c = cgr - cgr_mean
    cgr_var = jnp.sum(cgr_c * cgr_c) * (1.0 / float(F * T - 1))
    inv_cgr_std = 1.0 / (jnp.sqrt(cgr_var) + EPS)             # one scalar divide
    cgr_scaled = cgr_c * inv_cgr_std

    # --- x_scaled: per-feature (time axis = lanes) mean / unbiased std -------
    x_mean = jnp.sum(x, axis=1, keepdims=True) * (1.0 / float(T))
    x_c = x - x_mean
    x_var = jnp.sum(x_c * x_c, axis=1, keepdims=True) * (1.0 / float(T - 1))
    inv_x_std = pl.reciprocal(jnp.sqrt(x_var) + EPS, approx=True)   # (F,1), EUP
    x_scaled = x_c * inv_x_std

    # --- cgr_consistency = |corrcoef(x_scaled[~mask], cgr_scaled[~mask])| ---
    # One-pass masked Pearson sufficient statistics; torch.corrcoef's 1/(n-1)
    # normalization cancels in the ratio, so only masked sums are needed and
    # the centered temporaries are never materialized.
    au = x_scaled * um
    bu = cgr_scaled * um
    n_um = jnp.sum(um)
    s_a = jnp.sum(au)
    s_b = jnp.sum(bu)
    s_aa = jnp.sum(au * x_scaled)
    s_bb = jnp.sum(bu * cgr_scaled)
    s_ab = jnp.sum(au * cgr_scaled)
    inv_n_um = 1.0 / n_um            # NaN if fully masked — matches torch.corrcoef
    cov_ab = s_ab - s_a * s_b * inv_n_um
    var_a = s_aa - s_a * s_a * inv_n_um
    var_b = s_bb - s_b * s_b * inv_n_um
    cgr_consistency = jnp.abs(cov_ab) * lax.rsqrt(var_a * var_b)

    # --- range_loss = mean(relu(|x_scaled| - 5) * ~mask) over all elements --
    range_loss = jnp.sum(jnp.maximum(jnp.abs(x_scaled) - 5.0, 0.0) * um) * inv_n_total

    total = (0.3 * positivity + 0.3 * smoothness
             + 0.2 * cgr_consistency + 0.2 * range_loss)
    out_ref[...] = jnp.reshape(total, (1, 1))


def agri_consistency_loss(x, cgr, mask):
    """AgriConsistencyLoss.forward as one Pallas call.

    Args:
      x, cgr: (T, F) float arrays (float32 or bfloat16), time-major (dim 0 =
        time) exactly like the PyTorch module.  Passed through unchanged.
      mask:   (T, F) bool or integer array, True / nonzero = missing value
        (PyTorch's `mask`, used as `~mask`).  Passed through unchanged.

    Returns:
      (1, 1) float32 array holding the scalar loss; squeeze at the use site
      (avoids an extra tiny slice HLO per call).
    """
    assert x.ndim == 2 and x.shape == cgr.shape == mask.shape
    assert mask.dtype == jnp.bool_ or jnp.issubdtype(mask.dtype, jnp.integer), (
        "mask must be bool or integer (nonzero = missing)")
    return pl.pallas_call(
        _agri_loss_kernel,
        out_shape=jax.ShapeDtypeStruct((1, 1), jnp.float32),
        in_specs=[
            pl.BlockSpec(memory_space=pltpu.MemorySpace.VMEM),
            pl.BlockSpec(memory_space=pltpu.MemorySpace.VMEM),
            pl.BlockSpec(memory_space=pltpu.MemorySpace.VMEM),
        ],
        out_specs=pl.BlockSpec(memory_space=pltpu.MemorySpace.VMEM),
    )(x, cgr, mask)


def _reference(x, cgr, mask):
    """Pure-JAX replica of the PyTorch forward (for validation only)."""
    um = jnp.logical_not(mask).astype(jnp.float32)
    pos = jnp.mean(jax.nn.relu(-x) * um)
    smooth = jnp.mean(jnp.abs(x[1:] - x[:-1]))
    cgr_s = (cgr - cgr.mean()) / (jnp.std(cgr, ddof=1) + EPS)
    x_s = (x - x.mean(axis=0, keepdims=True)) / (
        jnp.std(x, axis=0, ddof=1, keepdims=True) + EPS)
    n = jnp.sum(um)
    am = jnp.sum(x_s * um) / n
    bm = jnp.sum(cgr_s * um) / n
    ac = (x_s - am) * um
    bc = (cgr_s - bm) * um
    corr = jnp.abs(jnp.sum(ac * bc) / jnp.sqrt(jnp.sum(ac * ac) * jnp.sum(bc * bc)))
    rng = jnp.mean(jax.nn.relu(jnp.abs(x_s) - 5.0) * um)
    return 0.3 * pos + 0.3 * smooth + 0.2 * corr + 0.2 * rng


if __name__ == "__main__":
    key = jax.random.PRNGKey(0)
    k1, k2, k3 = jax.random.split(key, 3)

    T, F = 128, 8  # 128 timesteps, 8 agronomic features
    x = jax.random.normal(k1, (T, F), dtype=jnp.float32)
    cgr = jax.random.normal(k2, (T, F), dtype=jnp.float32) * 0.5 + 1.0
    mask = jax.random.uniform(k3, (T, F)) < 0.3  # bool, True = missing value

    loss = agri_consistency_loss(x, cgr, mask)   # (1, 1) float32
    jax.block_until_ready(loss)

    ref = _reference(x, cgr, mask)
    # atol allows for the EUP approximate reciprocal in the per-feature 1/std.
    assert jnp.allclose(loss[0, 0], ref, rtol=1e-3, atol=1e-3), (loss, ref)

    print("KERNEL_OK")
</pallas_src>

<mosaic_0001>
module attributes {stable_mosaic.version = 11 : i64} {
  func.func @_agri_loss_kernel(%arg0: memref<128x8xf32, #tpu.memory_space<vmem>>, %arg1: memref<128x8xf32, #tpu.memory_space<vmem>>, %arg2: memref<128x8xi32, #tpu.memory_space<vmem>>, %arg3: memref<1x1xf32, #tpu.memory_space<vmem>>) attributes {dimension_semantics = [], scalar_prefetch = 0 : i64, scratch_operands = 0 : i64, tpu.core_type = #tpu.core_type<tc>} {
    %c0 = arith.constant 0 : index
    %c0_0 = arith.constant 0 : index
    %0 = vector.load %arg0[%c0, %c0_0] : memref<128x8xf32, #tpu.memory_space<vmem>>, vector<128x8xf32>
    %1 = tpu.transpose %0, [1, 0] : vector<128x8xf32> -> vector<8x128xf32>
    %c0_1 = arith.constant 0 : index
    %c0_2 = arith.constant 0 : index
    %2 = vector.load %arg1[%c0_1, %c0_2] : memref<128x8xf32, #tpu.memory_space<vmem>>, vector<128x8xf32>
    %3 = tpu.transpose %2, [1, 0] : vector<128x8xf32> -> vector<8x128xf32>
    %c0_3 = arith.constant 0 : index
    %c0_4 = arith.constant 0 : index
    %4 = vector.load %arg2[%c0_3, %c0_4] : memref<128x8xi32, #tpu.memory_space<vmem>>, vector<128x8xi32>
    %cst = arith.constant dense<0> : vector<128x8xi32>
    %5 = arith.cmpi ne, %4, %cst : vector<128x8xi32>
    %cst_5 = arith.constant 0.000000e+00 : f32
    %cst_6 = arith.constant 1.000000e+00 : f32
    %6 = vector.broadcast %cst_5 : f32 to vector<128x8xf32>
    %7 = vector.broadcast %cst_6 : f32 to vector<128x8xf32>
    %8 = arith.select %5, %6, %7 : vector<128x8xi1>, vector<128x8xf32>
    %9 = tpu.transpose %8, [1, 0] : vector<128x8xf32> -> vector<8x128xf32>
    %cst_7 = arith.constant 0.000000e+00 : f32
    %10 = vector.broadcast %cst_7 : f32 to vector<8x128xf32>
    %11 = arith.subf %10, %1 : vector<8x128xf32>
    %cst_8 = arith.constant 0.000000e+00 : f32
    %12 = vector.broadcast %cst_8 : f32 to vector<8x128xf32>
    %13 = arith.maximumf %11, %12 : vector<8x128xf32>
    %14 = arith.mulf %13, %9 : vector<8x128xf32>
    %15 = vector.shape_cast %14 : vector<8x128xf32> to vector<1x8x128xf32>
    %cst_9 = arith.constant dense<0.000000e+00> : vector<1xf32>
    %16 = vector.multi_reduction <add>, %15, %cst_9 [1, 2] : vector<1x8x128xf32> to vector<1xf32>
    %17 = vector.shape_cast %16 : vector<1xf32> to vector<1x1x1xf32>
    %18 = vector.extract %17[0, 0, 0] : f32 from vector<1x1x1xf32>
    %cst_10 = arith.constant 9.765625E-4 : f32
    %19 = arith.mulf %18, %cst_10 : f32
    %c1_i32 = arith.constant 1 : i32
    %20 = tpu.dynamic_rotate %1 by %c1_i32 dim 1 : vector<8x128xf32>, i32 -> vector<8x128xf32>
    %21 = arith.subf %20, %1 : vector<8x128xf32>
    %22 = math.absf %21 : vector<8x128xf32>
    %23 = vector.shape_cast %22 : vector<8x128xf32> to vector<1x8x128xf32>
    %cst_11 = arith.constant dense<0.000000e+00> : vector<1xf32>
    %24 = vector.multi_reduction <add>, %23, %cst_11 [1, 2] : vector<1x8x128xf32> to vector<1xf32>
    %25 = vector.shape_cast %24 : vector<1xf32> to vector<1x1x1xf32>
    %26 = vector.extract %25[0, 0, 0] : f32 from vector<1x1x1xf32>
    %27 = tpu.iota {dimensions = array<i32: 1>} : vector<8x128xi32>
    %c0_i32 = arith.constant 0 : i32
    %28 = vector.broadcast %c0_i32 : i32 to vector<8x128xi32>
    %29 = arith.cmpi eq, %27, %28 : vector<8x128xi32>
    %cst_12 = arith.constant 0.000000e+00 : f32
    %30 = vector.broadcast %cst_12 : f32 to vector<8x128xf32>
    %31 = arith.select %29, %1, %30 : vector<8x128xi1>, vector<8x128xf32>
    %cst_13 = arith.constant dense<0.000000e+00> : vector<8xf32>
    %32 = vector.multi_reduction <add>, %31, %cst_13 [1] : vector<8x128xf32> to vector<8xf32>
    %33 = vector.shape_cast %32 : vector<8xf32> to vector<8x1xf32>
    %c127_i32 = arith.constant 127 : i32
    %34 = vector.broadcast %c127_i32 : i32 to vector<8x128xi32>
    %35 = arith.cmpi eq, %27, %34 : vector<8x128xi32>
    %cst_14 = arith.constant 0.000000e+00 : f32
    %36 = vector.broadcast %cst_14 : f32 to vector<8x128xf32>
    %37 = arith.select %35, %1, %36 : vector<8x128xi1>, vector<8x128xf32>
    %cst_15 = arith.constant dense<0.000000e+00> : vector<8xf32>
    %38 = vector.multi_reduction <add>, %37, %cst_15 [1] : vector<8x128xf32> to vector<8xf32>
    %39 = vector.shape_cast %38 : vector<8xf32> to vector<8x1xf32>
    %40 = arith.subf %33, %39 : vector<8x1xf32>
    %41 = math.absf %40 : vector<8x1xf32>
    %42 = vector.shape_cast %41 : vector<8x1xf32> to vector<1x8x1xf32>
    %cst_16 = arith.constant dense<0.000000e+00> : vector<1xf32>
    %43 = vector.multi_reduction <add>, %42, %cst_16 [1, 2] : vector<1x8x1xf32> to vector<1xf32>
    %44 = vector.shape_cast %43 : vector<1xf32> to vector<1x1x1xf32>
    %45 = vector.extract %44[0, 0, 0] : f32 from vector<1x1x1xf32>
    %46 = arith.subf %26, %45 : f32
    %cst_17 = arith.constant 9.842520e-04 : f32
    %47 = arith.mulf %46, %cst_17 : f32
    %48 = vector.shape_cast %3 : vector<8x128xf32> to vector<1x8x128xf32>
    %cst_18 = arith.constant dense<0.000000e+00> : vector<1xf32>
    %49 = vector.multi_reduction <add>, %48, %cst_18 [1, 2] : vector<1x8x128xf32> to vector<1xf32>
    %50 = vector.shape_cast %49 : vector<1xf32> to vector<1x1x1xf32>
    %51 = vector.extract %50[0, 0, 0] : f32 from vector<1x1x1xf32>
    %cst_19 = arith.constant 9.765625E-4 : f32
    %52 = arith.mulf %51, %cst_19 : f32
    %53 = vector.broadcast %52 : f32 to vector<8x128xf32>
    %54 = arith.subf %3, %53 : vector<8x128xf32>
    %55 = arith.mulf %54, %54 : vector<8x128xf32>
    %56 = vector.shape_cast %55 : vector<8x128xf32> to vector<1x8x128xf32>
    %cst_20 = arith.constant dense<0.000000e+00> : vector<1xf32>
    %57 = vector.multi_reduction <add>, %56, %cst_20 [1, 2] : vector<1x8x128xf32> to vector<1xf32>
    %58 = vector.shape_cast %57 : vector<1xf32> to vector<1x1x1xf32>
    %59 = vector.extract %58[0, 0, 0] : f32 from vector<1x1x1xf32>
    %cst_21 = arith.constant 9.77517105E-4 : f32
    %60 = arith.mulf %59, %cst_21 : f32
    %61 = math.sqrt %60 : f32
    %cst_22 = arith.constant 9.99999993E-9 : f32
    %62 = arith.addf %61, %cst_22 : f32
    %cst_23 = arith.constant 1.000000e+00 : f32
    %63 = arith.divf %cst_23, %62 : f32
    %64 = vector.broadcast %63 : f32 to vector<8x128xf32>
    %65 = arith.mulf %54, %64 : vector<8x128xf32>
    %cst_24 = arith.constant dense<0.000000e+00> : vector<8xf32>
    %66 = vector.multi_reduction <add>, %1, %cst_24 [1] : vector<8x128xf32> to vector<8xf32>
    %67 = vector.shape_cast %66 : vector<8xf32> to vector<8x1xf32>
    %cst_25 = arith.constant 7.812500e-03 : f32
    %68 = vector.broadcast %cst_25 : f32 to vector<8x1xf32>
    %69 = arith.mulf %67, %68 : vector<8x1xf32>
    %70 = vector.broadcast %69 : vector<8x1xf32> to vector<8x128xf32>
    %71 = arith.subf %1, %70 : vector<8x128xf32>
    %72 = arith.mulf %71, %71 : vector<8x128xf32>
    %cst_26 = arith.constant dense<0.000000e+00> : vector<8xf32>
    %73 = vector.multi_reduction <add>, %72, %cst_26 [1] : vector<8x128xf32> to vector<8xf32>
    %74 = vector.shape_cast %73 : vector<8xf32> to vector<8x1xf32>
    %cst_27 = arith.constant 0.00787401571 : f32
    %75 = vector.broadcast %cst_27 : f32 to vector<8x1xf32>
    %76 = arith.mulf %74, %75 : vector<8x1xf32>
    %77 = math.sqrt %76 : vector<8x1xf32>
    %cst_28 = arith.constant 9.99999993E-9 : f32
    %78 = vector.broadcast %cst_28 : f32 to vector<8x1xf32>
    %79 = arith.addf %77, %78 : vector<8x1xf32>
    %80 = tpu.reciprocal %79 {approx = true} : vector<8x1xf32> -> vector<8x1xf32>
    %81 = vector.broadcast %80 : vector<8x1xf32> to vector<8x128xf32>
    %82 = arith.mulf %71, %81 : vector<8x128xf32>
    %83 = arith.mulf %82, %9 : vector<8x128xf32>
    %84 = arith.mulf %65, %9 : vector<8x128xf32>
    %85 = vector.shape_cast %9 : vector<8x128xf32> to vector<1x8x128xf32>
    %cst_29 = arith.constant dense<0.000000e+00> : vector<1xf32>
    %86 = vector.multi_reduction <add>, %85, %cst_29 [1, 2] : vector<1x8x128xf32> to vector<1xf32>
    %87 = vector.shape_cast %86 : vector<1xf32> to vector<1x1x1xf32>
    %88 = vector.extract %87[0, 0, 0] : f32 from vector<1x1x1xf32>
    %89 = vector.shape_cast %83 : vector<8x128xf32> to vector<1x8x128xf32>
    %cst_30 = arith.constant dense<0.000000e+00> : vector<1xf32>
    %90 = vector.multi_reduction <add>, %89, %cst_30 [1, 2] : vector<1x8x128xf32> to vector<1xf32>
    %91 = vector.shape_cast %90 : vector<1xf32> to vector<1x1x1xf32>
    %92 = vector.extract %91[0, 0, 0] : f32 from vector<1x1x1xf32>
    %93 = vector.shape_cast %84 : vector<8x128xf32> to vector<1x8x128xf32>
    %cst_31 = arith.constant dense<0.000000e+00> : vector<1xf32>
    %94 = vector.multi_reduction <add>, %93, %cst_31 [1, 2] : vector<1x8x128xf32> to vector<1xf32>
    %95 = vector.shape_cast %94 : vector<1xf32> to vector<1x1x1xf32>
    %96 = vector.extract %95[0, 0, 0] : f32 from vector<1x1x1xf32>
    %97 = arith.mulf %83, %82 : vector<8x128xf32>
    %98 = vector.shape_cast %97 : vector<8x128xf32> to vector<1x8x128xf32>
    %cst_32 = arith.constant dense<0.000000e+00> : vector<1xf32>
    %99 = vector.multi_reduction <add>, %98, %cst_32 [1, 2] : vector<1x8x128xf32> to vector<1xf32>
    %100 = vector.shape_cast %99 : vector<1xf32> to vector<1x1x1xf32>
    %101 = vector.extract %100[0, 0, 0] : f32 from vector<1x1x1xf32>
    %102 = arith.mulf %84, %65 : vector<8x128xf32>
    %103 = vector.shape_cast %102 : vector<8x128xf32> to vector<1x8x128xf32>
    %cst_33 = arith.constant dense<0.000000e+00> : vector<1xf32>
    %104 = vector.multi_reduction <add>, %103, %cst_33 [1, 2] : vector<1x8x128xf32> to vector<1xf32>
    %105 = vector.shape_cast %104 : vector<1xf32> to vector<1x1x1xf32>
    %106 = vector.extract %105[0, 0, 0] : f32 from vector<1x1x1xf32>
    %107 = arith.mulf %83, %65 : vector<8x128xf32>
    %108 = vector.shape_cast %107 : vector<8x128xf32> to vector<1x8x128xf32>
    %cst_34 = arith.constant dense<0.000000e+00> : vector<1xf32>
    %109 = vector.multi_reduction <add>, %108, %cst_34 [1, 2] : vector<1x8x128xf32> to vector<1xf32>
    %110 = vector.shape_cast %109 : vector<1xf32> to vector<1x1x1xf32>
    %111 = vector.extract %110[0, 0, 0] : f32 from vector<1x1x1xf32>
    %cst_35 = arith.constant 1.000000e+00 : f32
    %112 = arith.divf %cst_35, %88 : f32
    %113 = arith.mulf %92, %96 : f32
    %114 = arith.mulf %113, %112 : f32
    %115 = arith.subf %111, %114 : f32
    %116 = arith.mulf %92, %92 : f32
    %117 = arith.mulf %116, %112 : f32
    %118 = arith.subf %101, %117 : f32
    %119 = arith.mulf %96, %96 : f32
    %120 = arith.mulf %119, %112 : f32
    %121 = arith.subf %106, %120 : f32
    %122 = math.absf %115 : f32
    %123 = arith.mulf %118, %121 : f32
    %124 = math.rsqrt %123 : f32
    %125 = arith.mulf %122, %124 : f32
    %126 = math.absf %82 : vector<8x128xf32>
    %cst_36 = arith.constant 5.000000e+00 : f32
    %127 = vector.broadcast %cst_36 : f32 to vector<8x128xf32>
    %128 = arith.subf %126, %127 : vector<8x128xf32>
    %cst_37 = arith.constant 0.000000e+00 : f32
    %129 = vector.broadcast %cst_37 : f32 to vector<8x128xf32>
    %130 = arith.maximumf %128, %129 : vector<8x128xf32>
    %131 = arith.mulf %130, %9 : vector<8x128xf32>
    %132 = vector.shape_cast %131 : vector<8x128xf32> to vector<1x8x128xf32>
    %cst_38 = arith.constant dense<0.000000e+00> : vector<1xf32>
    %133 = vector.multi_reduction <add>, %132, %cst_38 [1, 2] : vector<1x8x128xf32> to vector<1xf32>
    %134 = vector.shape_cast %133 : vector<1xf32> to vector<1x1x1xf32>
    %135 = vector.extract %134[0, 0, 0] : f32 from vector<1x1x1xf32>
    %cst_39 = arith.constant 9.765625E-4 : f32
    %136 = arith.mulf %135, %cst_39 : f32
    %cst_40 = arith.constant 3.000000e-01 : f32
    %137 = arith.mulf %cst_40, %19 : f32
    %cst_41 = arith.constant 3.000000e-01 : f32
    %138 = arith.mulf %cst_41, %47 : f32
    %139 = arith.addf %137, %138 : f32
    %cst_42 = arith.constant 2.000000e-01 : f32
    %140 = arith.mulf %cst_42, %125 : f32
    %141 = arith.addf %139, %140 : f32
    %cst_43 = arith.constant 2.000000e-01 : f32
    %142 = arith.mulf %cst_43, %136 : f32
    %143 = arith.addf %141, %142 : f32
    %144 = vector.broadcast %143 : f32 to vector<1x1xf32>
    %c0_44 = arith.constant 0 : index
    %c0_45 = arith.constant 0 : index
    %145 = vector.load %arg3[%c0_44, %c0_45] : memref<1x1xf32, #tpu.memory_space<vmem>>, vector<1x1xf32>
    tpu.vector_store %arg3[%c0_44, %c0_45], %144 {strides = array<i32>} : memref<1x1xf32, #tpu.memory_space<vmem>>, vector<1x1xf32>,
    return
  }
}

</mosaic_0001>

<bundles_post_ra>
// kernel: tpu_custom_call.1
= control target key start
LH: loop header
LB: loop body
LE: loop exit
PB: predicated region body
PF: predicated region fallthrough
CT: control target
= control target key end

     0   :  { %s704_s0 = inlined_call_operand.vmem [shape: f32[128,8], index: 0, kind: input, shape index: {}]   ;;  %s705_s1 = inlined_call_operand.vmem [shape: f32[128,8], index: 1, kind: input, shape index: {}]   ;;  %s706_s2 = inlined_call_operand.vmem [shape: s32[128,8], index: 2, kind: input, shape index: {}]   ;;  %s707_s3 = inlined_call_operand.hbm [shape: f32[1,1], index: 3, kind: output, shape index: {}]  }
   0x1   :  { %v15_v0 = vld [vmem:[%s704_s0] sm:$0xff]  ;;  %v16_v1 = vld [vmem:[%s704_s0 + $0x8] sm:$0xff]  ;;  %v17_v2 = vld [vmem:[%s704_s0 + $0x10] sm:$0xff] }
   0x2   :  { %31 = vxpose.xlu0.b32.start [1/16] (narrow) %v15_v0, 8 }
   0x6   :  { %32 = vxpose.xlu0.b32.cont [2/16] (narrow) %v16_v1, 8 }
   0x7   :  { %8 = vsyncpa [#allocation3], 0  ;;  %v18_v3 = vld [vmem:[%s704_s0 + $0x18] sm:$0xff]  ;;  %v19_v4 = vld [vmem:[%s704_s0 + $0x20] sm:$0xff]  ;;  %s485_s21 = smov 1   ;;  %v217_v33 = vlaneseq  ;;  %v486_v39 = vmov 1.0  }
   0x8   :  { %v20_v5 = vld [vmem:[%s704_s0 + $0x28] sm:$0xff]  ;;  %v21_v6 = vld [vmem:[%s704_s0 + $0x30] sm:$0xff]  ;;  %v22_v7 = vld [vmem:[%s704_s0 + $0x38] sm:$0xff] }
   0x9   :  { %v23_v8 = vld [vmem:[%s704_s0 + $0x40] sm:$0xff]  ;;  %v24_v9 = vld [vmem:[%s704_s0 + $0x48] sm:$0xff]  ;;  %v25_v10 = vld [vmem:[%s704_s0 + $0x50] sm:$0xff]  ;;  %v218_v34 = vand.u32 127, %v217_v33 }
   0xa   :  { %33 = vxpose.xlu0.b32.cont [3/16] (narrow) %v17_v2, 8  ;;  %v26_v11 = vld [vmem:[%s704_s0 + $0x58] sm:$0xff]  ;;  %v27_v12 = vld [vmem:[%s704_s0 + $0x60] sm:$0xff]  ;;  %v28_v13 = vld [vmem:[%s704_s0 + $0x68] sm:$0xff] }
   0xb   :  { %v29_v14 = vld [vmem:[%s704_s0 + $0x70] sm:$0xff]  ;;  %v30_v15 = vld [vmem:[%s704_s0 + $0x78] sm:$0xff]  ;;  %v63_v16 = vld [vmem:[%s705_s1] sm:$0xff]  ;;  %vm219_vm0 = vcmp.eq.s32.totalorder %v218_v34, 0  ;;  %vm223_vm1 = vcmp.eq.s32.totalorder %v218_v34, 127 }
   0xc   :  { %v64_v17 = vld [vmem:[%s705_s1 + $0x8] sm:$0xff]  ;;  %v65_v18 = vld [vmem:[%s705_s1 + $0x10] sm:$0xff]  ;;  %v66_v19 = vld [vmem:[%s705_s1 + $0x18] sm:$0xff] }
   0xd   :  { %v67_v20 = vld [vmem:[%s705_s1 + $0x20] sm:$0xff]  ;;  %v68_v21 = vld [vmem:[%s705_s1 + $0x28] sm:$0xff]  ;;  %v69_v22 = vld [vmem:[%s705_s1 + $0x30] sm:$0xff] }
   0xe   :  { %34 = vxpose.xlu0.b32.cont [4/16] (narrow) %v18_v3, 8  ;;  %v70_v23 = vld [vmem:[%s705_s1 + $0x38] sm:$0xff]  ;;  %v71_v24 = vld [vmem:[%s705_s1 + $0x40] sm:$0xff]  ;;  %v72_v25 = vld [vmem:[%s705_s1 + $0x48] sm:$0xff] }
   0xf   :  { %v73_v26 = vld [vmem:[%s705_s1 + $0x50] sm:$0xff]  ;;  %v74_v27 = vld [vmem:[%s705_s1 + $0x58] sm:$0xff]  ;;  %v75_v28 = vld [vmem:[%s705_s1 + $0x60] sm:$0xff] }
  0x10   :  { %v76_v29 = vld [vmem:[%s705_s1 + $0x68] sm:$0xff]  ;;  %v77_v30 = vld [vmem:[%s705_s1 + $0x70] sm:$0xff]  ;;  %v78_v31 = vld [vmem:[%s705_s1 + $0x78] sm:$0xff] }
  0x11   :  { %v111_v37 = vld [vmem:[%s706_s2] sm:$0xff]  ;;  %v112_v38 = vld [vmem:[%s706_s2 + $0x8] sm:$0xff]  ;;  %v113_v41 = vld [vmem:[%s706_s2 + $0x10] sm:$0xff] }
  0x12   :  { %35 = vxpose.xlu0.b32.cont [5/16] (narrow) %v19_v4, 8  ;;  %vm127_vm2 = vcmp.ne.s32.totalorder %v111_v37, 0  ;;  %vm128_vm3 = vcmp.ne.s32.totalorder %v112_v38, 0  ;;  %vm129_vm4 = vcmp.ne.s32.totalorder %v113_v41, 0  ;;  %v114_v43 = vld [vmem:[%s706_s2 + $0x18] sm:$0xff]  ;;  %v115_v45 = vld [vmem:[%s706_s2 + $0x20] sm:$0xff] }
  0x13   :  { %v143_v40 = vsel %vm127_vm2, 0.0, %v486_v39  ;;  %v144_v42 = vsel %vm128_vm3, 0.0, %v486_v39  ;;  %v145_v44 = vsel %vm129_vm4, 0.0, %v486_v39  ;;  %vm130_vm5 = vcmp.ne.s32.totalorder %v114_v43, 0  ;;  %v116_v47 = vld [vmem:[%s706_s2 + $0x28] sm:$0xff]  ;;  %v117_v49 = vld [vmem:[%s706_s2 + $0x30] sm:$0xff] }
  0x14   :  { %v146_v46 = vsel %vm130_vm5, 0.0, %v486_v39  ;;  %vm131_vm6 = vcmp.ne.s32.totalorder %v115_v45, 0  ;;  %vm132_vm7 = vcmp.ne.s32.totalorder %v116_v47, 0  ;;  %vm133_vm8 = vcmp.ne.s32.totalorder %v117_v49, 0  ;;  %v118_v51 = vld [vmem:[%s706_s2 + $0x38] sm:$0xff]  ;;  %v119_v54 = vld [vmem:[%s706_s2 + $0x40] sm:$0xff] }
  0x15   :  { %v147_v48 = vsel %vm131_vm6, 0.0, %v486_v39  ;;  %v148_v50 = vsel %vm132_vm7, 0.0, %v486_v39  ;;  %v149_v52 = vsel %vm133_vm8, 0.0, %v486_v39  ;;  %vm134_vm9 = vcmp.ne.s32.totalorder %v118_v51, 0  ;;  %v120_v58 = vld [vmem:[%s706_s2 + $0x48] sm:$0xff]  ;;  %v121_v60 = vld [vmem:[%s706_s2 + $0x50] sm:$0xff] }
  0x16   :  { %36 = vxpose.xlu0.b32.cont [6/16] (narrow) %v20_v5, 8  ;;  %v150_v56 = vsel %vm134_vm9, 0.0, %v486_v39  ;;  %vm135_vm10 = vcmp.ne.s32.totalorder %v119_v54, 0  ;;  %vm136_vm11 = vcmp.ne.s32.totalorder %v120_v58, 0  ;;  %vm137_vm12 = vcmp.ne.s32.totalorder %v121_v60, 0  ;;  %v122_v62 = vld [vmem:[%s706_s2 + $0x58] sm:$0xff] }
  0x17   :  { %v151_v59 = vsel %vm135_vm10, 0.0, %v486_v39  ;;  %v152_v61 = vsel %vm136_vm11, 0.0, %v486_v39  ;;  %v153_v63 = vsel %vm137_vm12, 0.0, %v486_v39  ;;  %vm138_vm13 = vcmp.ne.s32.totalorder %v122_v62, 0  ;;  %v123_v0 = vld [vmem:[%s706_s2 + $0x60] sm:$0xff]  ;;  %v124_v2 = vld [vmem:[%s706_s2 + $0x68] sm:$0xff] }
  0x18   :  { %v154_v1 = vsel %vm138_vm13, 0.0, %v486_v39  ;;  %vm139_vm14 = vcmp.ne.s32.totalorder %v123_v0, 0  ;;  %vm140_vm15 = vcmp.ne.s32.totalorder %v124_v2, 0  ;;  %v125_v4 = vld [vmem:[%s706_s2 + $0x70] sm:$0xff]  ;;  %vm229_vm2 = vcmask 7168  }
  0x19   :  { %v155_v3 = vsel %vm139_vm14, 0.0, %v486_v39  ;;  %v156_v5 = vsel %vm140_vm15, 0.0, %v486_v39  ;;  %vm397_vm7 = vcmask 0  }
  0x1a   :  { %37 = vxpose.xlu0.b32.cont [7/16] (narrow) %v21_v6, 8  ;;  %v126_v6 = vld [vmem:[%s706_s2 + $0x78] sm:$0xff] }
  0x1e   :  { %38 = vxpose.xlu0.b32.cont [8/16] (narrow) %v22_v7, 8 }
  0x22   :  { %39 = vxpose.xlu0.b32.cont [9/16] (narrow) %v23_v8, 8 }
  0x26   :  { %40 = vxpose.xlu0.b32.cont [10/16] (narrow) %v24_v9, 8 }
  0x2a   :  { %41 = vxpose.xlu0.b32.cont [11/16] (narrow) %v25_v10, 8 }
  0x2e   :  { %42 = vxpose.xlu0.b32.cont [12/16] (narrow) %v26_v11, 8 }
  0x32   :  { %43 = vxpose.xlu0.b32.cont [13/16] (narrow) %v27_v12, 8 }
  0x36   :  { %44 = vxpose.xlu0.b32.cont [14/16] (narrow) %v28_v13, 8 }
  0x3a   :  { %45 = vxpose.xlu0.b32.cont [15/16] (narrow) %v29_v14, 8 }
  0x3e   :  { %46 = vxpose.xlu0.b32.end [16/16] (narrow) %v30_v15, 8 }
  0x42   :  { %79 = vxpose.xlu0.b32.start [1/16] (narrow) %v63_v16, 8 }
  0x46   :  { %80 = vxpose.xlu0.b32.cont [2/16] (narrow) %v64_v17, 8 }
  0x4a   :  { %81 = vxpose.xlu0.b32.cont [3/16] (narrow) %v65_v18, 8 }
  0x4e   :  { %82 = vxpose.xlu0.b32.cont [4/16] (narrow) %v66_v19, 8 }
  0x52   :  { %83 = vxpose.xlu0.b32.cont [5/16] (narrow) %v67_v20, 8 }
  0x56   :  { %84 = vxpose.xlu0.b32.cont [6/16] (narrow) %v68_v21, 8 }
  0x5a   :  { %85 = vxpose.xlu0.b32.cont [7/16] (narrow) %v69_v22, 8 }
  0x5e   :  { %86 = vxpose.xlu0.b32.cont [8/16] (narrow) %v70_v23, 8 }
  0x62   :  { %87 = vxpose.xlu0.b32.cont [9/16] (narrow) %v71_v24, 8 }
  0x66   :  { %88 = vxpose.xlu0.b32.cont [10/16] (narrow) %v72_v25, 8 }
  0x6a   :  { %89 = vxpose.xlu0.b32.cont [11/16] (narrow) %v73_v26, 8 }
  0x6e   :  { %90 = vxpose.xlu0.b32.cont [12/16] (narrow) %v74_v27, 8 }
  0x72   :  { %91 = vxpose.xlu0.b32.cont [13/16] (narrow) %v75_v28, 8 }
  0x76   :  { %92 = vxpose.xlu0.b32.cont [14/16] (narrow) %v76_v29, 8 }
  0x7a   :  { %93 = vxpose.xlu0.b32.cont [15/16] (narrow) %v77_v30, 8 }
  0x7e   :  { %94 = vxpose.xlu0.b32.end [16/16] (narrow) %v78_v31, 8 }
  0x82   :  { %v604_v32 = vpop.trf.xlu0 }
  0x83   :  { %204 = vrot.lane.b32.xlu1 %v604_v32, %s485_s21  ;;  %v220_v35 = vsel %vm219_vm0, %v604_v32, 0.0  ;;  %v224_v36 = vsel %vm223_vm1, %v604_v32, 0.0  ;;  %vm141_vm0 = vcmp.ne.s32.totalorder %v125_v4, 0  ;;  %vm142_vm1 = vcmp.ne.s32.totalorder %v126_v6, 0 }
  0x84   :  { %v157_v7 = vsel %vm141_vm0, 0.0, %v486_v39  ;;  %v158_v8 = vsel %vm142_vm1, 0.0, %v486_v39  ;;  %v191_v11 = vsub.f32 0.0, %v604_v32 }
  0x86   :  { %v192_v13 = vmax.f32 %v191_v11, 0.0 }
  0xa7   :  { %221 = vadd.xlane.f32.xlu1 %v220_v35 }
  0xab   :  { %225 = vadd.xlane.f32.xlu1 %v224_v36 }
  0xc2   :  { %v95_v18 = vpop.trf.xlu0 }
  0xde   :  { %159 = vxpose.xlu1.b32.start [1/16] (narrow) %v143_v40, 8 }
  0xe2   :  { %160 = vxpose.xlu1.b32.cont [2/16] (narrow) %v144_v42, 8 }
  0xe6   :  { %161 = vxpose.xlu1.b32.cont [3/16] (narrow) %v145_v44, 8 }
  0xea   :  { %162 = vxpose.xlu1.b32.cont [4/16] (narrow) %v146_v46, 8 }
  0xee   :  { %163 = vxpose.xlu1.b32.cont [5/16] (narrow) %v147_v48, 8 }
  0xf2   :  { %164 = vxpose.xlu1.b32.cont [6/16] (narrow) %v148_v50, 8 }
  0xf5   :  { %v205_v53 = vpop.permute.xlu1 %204 }
  0xf6   :  { %v206_v55 = vsub.f32 %v205_v53, %v604_v32  ;;  %165 = vxpose.xlu1.b32.cont [7/16] (narrow) %v149_v52, 8 }
  0xf8   :  { %v207_v57 = vand.u32 2147483647, %v206_v55 }
  0xfa   :  { %166 = vxpose.xlu1.b32.cont [8/16] (narrow) %v150_v56, 8  ;;  %208 = vadd.xlane.f32.xlu0 %v207_v57 }
  0xfe   :  { %167 = vxpose.xlu1.b32.cont [9/16] (narrow) %v151_v59, 8 }
 0x102   :  { %168 = vxpose.xlu1.b32.cont [10/16] (narrow) %v152_v61, 8 }
 0x106   :  { %169 = vxpose.xlu1.b32.cont [11/16] (narrow) %v153_v63, 8 }
 0x10a   :  { %170 = vxpose.xlu1.b32.cont [12/16] (narrow) %v154_v1, 8 }
 0x10e   :  { %171 = vxpose.xlu1.b32.cont [13/16] (narrow) %v155_v3, 8 }
 0x112   :  { %172 = vxpose.xlu1.b32.cont [14/16] (narrow) %v156_v5, 8 }
 0x116   :  { %173 = vxpose.xlu1.b32.cont [15/16] (narrow) %v157_v7, 8 }
 0x11a   :  { %174 = vxpose.xlu1.b32.end [16/16] (narrow) %v158_v8, 8 }
 0x134   :  { %v222_v9 = vpop.xlane.xlu1 %221 }
 0x138   :  { %v226_v10 = vpop.xlane.xlu1 %225 }
 0x139   :  { %v227_v12 = vsub.f32 %v222_v9, %v226_v10 }
 0x13b   :  { %v228_v16 = vand.u32 2147483647, %v227_v12 }
 0x13d   :  { %v230_v17 = vsel %vm229_vm2, %v228_v16, 0.0 }
 0x15e   :  { %v675_v14 = vpop.trf.xlu1 }
 0x15f   :  { %v193_v15 = vmul.f32 %v192_v13, %v675_v14 }
 0x161   :  { %194 = vadd.xlane.f32.xlu1 %v193_v15 }
 0x165   :  { %231 = vadd.xlane.f32.xlu1 %v230_v17 }
 0x169   :  { %242 = vadd.xlane.f32.xlu1 %v95_v18 }
 0x16d   :  { %280 = vadd.xlane.f32.xlu1 %v604_v32 }
 0x171   :  { %300 = vadd.xlane.f32.xlu1 %v675_v14 }
 0x187   :  { %v209_v19 = vpop.xlane.xlu0 %208 }
 0x188   :  { %v210_v20 = vrot.slane %v209_v19, 4 }
 0x18a   :  { %v211_v21 = vadd.f32 %v210_v20, %v209_v19 }
 0x18c   :  { %v212_v22 = vrot.slane %v211_v21, 2 }
 0x18e   :  { %v213_v27 = vadd.f32 %v212_v22, %v211_v21 }
 0x190   :  { %v214_v34 = vrot.slane %v213_v27, 1 }
 0x192   :  { %v215_v41 = vadd.f32 %v214_v34, %v213_v27 }
 0x1ee   :  { %v195_v23 = vpop.xlane.xlu1 %194 }
 0x1ef   :  { %v196_v24 = vrot.slane %v195_v23, 4 }
 0x1f1   :  { %v197_v25 = vadd.f32 %v196_v24, %v195_v23 }
 0x1f2   :  { %v232_v26 = vpop.xlane.xlu1 %231 }
 0x1f3   :  { %v198_v28 = vrot.slane %v197_v25, 2  ;;  %v233_v29 = vrot.slane %v232_v26, 4 }
 0x1f5   :  { %v234_v30 = vadd.f32 %v233_v29, %v232_v26  ;;  %v199_v31 = vadd.f32 %v198_v28, %v197_v25 }
 0x1f6   :  { %v243_v33 = vpop.xlane.xlu1 %242 }
 0x1f7   :  { %v235_v35 = vrot.slane %v234_v30, 2  ;;  %v244_v36 = vrot.slane %v243_v33, 4  ;;  %v200_v37 = vrot.slane %v199_v31, 1 }
 0x1f9   :  { %v245_v38 = vadd.f32 %v244_v36, %v243_v33  ;;  %v201_v39 = vadd.f32 %v200_v37, %v199_v31  ;;  %v236_v40 = vadd.f32 %v235_v35, %v234_v30 }
 0x1fa   :  { %v281_v48 = vpop.xlane.xlu1 %280 }
 0x1fb   :  { %v246_v42 = vrot.slane %v245_v38, 2  ;;  %414 = vpush %v201_v39  ;;  %v237_v43 = vrot.slane %v236_v40, 1  ;;  %v282_v49 = vmul.f32 0.0078125, %v281_v48 }
 0x1fc   :  { %416 = vpush %v215_v41 }
 0x1fd   :  { %v238_v44 = vadd.f32 %v237_v43, %v236_v40  ;;  %v247_v45 = vadd.f32 %v246_v42, %v245_v38  ;;  %v283_v52 = vsub.f32 %v604_v32, %v282_v49 }
 0x1fe   :  { %v301_v16 = vpop.xlane.xlu1 %300 }
 0x1ff   :  { %418 = vpush %v238_v44  ;;  %v248_v46 = vrot.slane %v247_v45, 1  ;;  %v284_v54 = vmul.f32 %v283_v52, %v283_v52  ;;  %v302_v17 = vrot.slane %v301_v16, 4 }
 0x201   :  { %v249_v47 = vadd.f32 %v248_v46, %v247_v45 }
 0x203   :  { %420 = vpush %v249_v47 }
 0x22c   :  { %s415_s2 = spop %414 }
 0x22d   :  { %s417_s24 = spop %416  ;;  %s203_s0 = smul.f32 0.0009765625, %s415_s2 }
 0x22f   :  { %s389_s28 = smul.f32 0.3, %s203_s0 }
 0x230   :  { %s419_s25 = spop %418 }
 0x231   :  { %s240_s26 = ssub.f32 %s417_s24, %s419_s25 }
 0x233   :  { %s241_s27 = smul.f32 0.000984252, %s240_s26 }
 0x234   :  { %s421_s29 = spop %420 }
 0x235   :  { %s390_s30 = smul.f32 0.3, %s241_s27 }
 0x236   :  { %s251_s4 = smul.f32 0.0009765625, %s421_s29 }
 0x237   :  { %s680_s5 = sadd.f32 %s390_s30, %s389_s28 }
 0x238   :  { %v252_v50 = vstv %s251_s4  ;;  %s487_s4 = smov [#allocation2]  }
 0x239   :  { %v682_v51 = vsub.f32 %v95_v18, %v252_v50  ;;  %v303_v18 = vadd.f32 %v302_v17, %v301_v16 }
 0x23b   :  { %v254_v53 = vmul.f32 %v682_v51, %v682_v51  ;;  %v304_v19 = vrot.slane %v303_v18, 2 }
 0x23d   :  { %255 = vadd.xlane.f32.xlu0 %v254_v53  ;;  %v305_v21 = vadd.f32 %v304_v19, %v303_v18 }
 0x23f   :  { %v306_v22 = vrot.slane %v305_v21, 1 }
 0x241   :  { %285 = vadd.xlane.f32.xlu0 %v284_v54  ;;  %v307_v24 = vadd.f32 %v306_v22, %v305_v21 }
 0x2ca   :  { %v256_v55 = vpop.xlane.xlu0 %255 }
 0x2cb   :  { %v257_v56 = vrot.slane %v256_v55, 4 }
 0x2cd   :  { %v258_v57 = vadd.f32 %v257_v56, %v256_v55 }
 0x2ce   :  { %v286_v58 = vpop.xlane.xlu0 %285 }
 0x2cf   :  { %v259_v59 = vrot.slane %v258_v57, 2  ;;  %v287_v60 = vmul.f32 0.007874016, %v286_v58 }
 0x2d1   :  { %449 = vrsqrt.f32 %v287_v60  ;;  %v260_v61 = vadd.f32 %v259_v59, %v258_v57  ;;  %vm290_vm3 = vcmp.eq.f32.partialorder %v287_v60, inf  ;;  %v293_v32 = vand.u32 2147483648, %v287_v60 }
 0x2d2   :  { %vm292_vm4 = vcmp.eq.f32.partialorder %v287_v60, 0.0 }
 0x2d3   :  { %v261_v62 = vrot.slane %v260_v61, 1 }
 0x2d5   :  { %v262_v63 = vadd.f32 %v261_v62, %v260_v61 }
 0x2d7   :  { %422 = vpush %v262_v63 }
 0x2db   :  { %v450_v0 = vpop.eup %449 }
 0x2dc   :  { %v289_v1 = vmul.f32 %v450_v0, %v287_v60 }
 0x2de   :  { %v291_v2 = vsel %vm290_vm3, %v287_v60, %v289_v1 }
 0x2df   :  { %v294_v3 = vsel %vm292_vm4, %v293_v32, %v291_v2 }
 0x2e0   :  { %v295_v4 = vadd.f32 1e-08, %v294_v3 }
 0x2e2   :  { %451 = vrcp.f32 %v295_v4 }
 0x2ec   :  { %v452_v5 = vpop.eup %451 }
 0x2ed   :  { %v297_v6 = vmul.f32 %v452_v5, %v283_v52 }
 0x2ef   :  { %v298_v7 = vmul.f32 %v297_v6, %v675_v14  ;;  %v375_v33 = vand.u32 2147483647, %v297_v6 }
 0x2f1   :  { %309 = vadd.xlane.f32.xlu0 %v298_v7  ;;  %v327_v8 = vmul.f32 %v298_v7, %v297_v6  ;;  %v413_v38 = vadd.f32 -5.0, %v375_v33 }
 0x2f3   :  { %v377_v40 = vmax.f32 %v413_v38, 0.0 }
 0x2f5   :  { %328 = vadd.xlane.f32.xlu0 %v327_v8  ;;  %v378_v41 = vmul.f32 %v377_v40, %v675_v14 }
 0x308   :  { %s423_s6 = spop %422 }
 0x309   :  { %s264_s7 = smul.f32 0.0009775171, %s423_s6  ;;  %s405_s6 = sshll.u32 %s487_s4, 4  ;;  %s406_s6 = int_to_ptr.vmem [resolvable:$true] %s405_s6 }
 0x30a   :  { %p466_p1 = scmp.lt.s32.totalorder %s406_s6, %s406_s6 }
 0x30b   :  { %v265_v9 = vstv %s264_s7 }
 0x30c   :  { %453 = vrsqrt.f32 %v265_v9  ;;  %vm268_vm5 = vcmp.eq.f32.partialorder %v265_v9, inf  ;;  %v271_v12 = vand.u32 2147483648, %v265_v9  ;;  %vm270_vm6 = vcmp.eq.f32.partialorder %v265_v9, 0.0 }
 0x316   :  { %v454_v10 = vpop.eup %453 }
 0x317   :  { %v267_v11 = vmul.f32 %v454_v10, %v265_v9 }
 0x319   :  { %v269_v13 = vsel %vm268_vm5, %v265_v9, %v267_v11 }
 0x31a   :  { %v272_v15 = vsel %vm270_vm6, %v271_v12, %v269_v13 }
 0x31b   :  { %424 = vpush %v272_v15 }
 0x34c   :  { %s425_s8 = spop %424 }
 0x34d   :  { %s274_s9 = sadd.f32 1e-08, %s425_s8 }
 0x34f   :  { %v275_v20 = vstv %s274_s9 }
 0x350   :  { %455 = vrcp.f32 %v275_v20 }
 0x35a   :  { %v456_v23 = vpop.eup %455 }
 0x35b   :  { %426 = vpush %v456_v23 }
 0x35c   :  { %428 = vpush %v307_v24 }
 0x37e   :  { %v310_v25 = vpop.xlane.xlu0 %309 }
 0x37f   :  { %v311_v26 = vrot.slane %v310_v25, 4 }
 0x381   :  { %v312_v27 = vadd.f32 %v311_v26, %v310_v25 }
 0x382   :  { %v329_v42 = vpop.xlane.xlu0 %328 }
 0x383   :  { %v313_v28 = vrot.slane %v312_v27, 2  ;;  %v330_v43 = vrot.slane %v329_v42, 4 }
 0x385   :  { %v314_v29 = vadd.f32 %v313_v28, %v312_v27  ;;  %v331_v44 = vadd.f32 %v330_v43, %v329_v42 }
 0x387   :  { %v315_v30 = vrot.slane %v314_v29, 1  ;;  %v332_v45 = vrot.slane %v331_v44, 2 }
 0x389   :  { %v316_v31 = vadd.f32 %v315_v30, %v314_v29  ;;  %v333_v53 = vadd.f32 %v332_v45, %v331_v44 }
 0x38b   :  { %430 = vpush %v316_v31  ;;  %v334_v60 = vrot.slane %v333_v53, 1 }
 0x38c   :  { %s427_s10 = spop %426 }
 0x38d   :  { %v278_v34 = vstv %s427_s10  ;;  %s429_s11 = spop %428  ;;  %v335_v1 = vadd.f32 %v334_v60, %v333_v53  ;;  %s461_s10 = scalar_lea.vmem %s406_s6, 16 }
 0x38e   :  { %v279_v35 = vmul.f32 %v278_v34, %v682_v51  ;;  %v357_v54 = vstv %s429_s11  ;;  %p462_p0 = scmp.ne.s32.totalorder %s406_s6, %s461_s10  ;;  %s465_s11 = scalar_lea.vmem %s406_s6, 32 }
 0x38f   :  { %457 = vrcp.f32 %v357_v54  ;;  %p467_p2 = scmp.lt.s32.totalorder %s465_s11, %s461_s10 }
 0x390   :  { %v299_v36 = vmul.f32 %v279_v35, %v675_v14  ;;  %v347_v37 = vmul.f32 %v298_v7, %v279_v35 }
 0x391   :  { %p468_p3 = por %p467_p2, %p466_p1 }
 0x392   :  { %318 = vadd.xlane.f32.xlu1 %v299_v36  ;;  %348 = vadd.xlane.f32.xlu0 %v347_v37  ;;  %v337_v39 = vmul.f32 %v299_v36, %v279_v35 }
 0x393   :  { %p469_p4 = pnand %p468_p3, %p462_p0 }
 0x396   :  { %338 = vadd.xlane.f32.xlu1 %v337_v39 }
 0x399   :  { %v458_v5 = vpop.eup %457 }
 0x39a   :  { %379 = vadd.xlane.f32.xlu1 %v378_v41 }
 0x3bc   :  { %s431_s12 = spop %430 }
 0x3bd   :  { %s363_s17 = smul.f32 %s431_s12, %s431_s12 }
 0x41f   :  { %v349_v46 = vpop.xlane.xlu0 %348  ;;  %v319_v47 = vpop.xlane.xlu1 %318 }
 0x420   :  { %v350_v48 = vrot.slane %v349_v46, 4  ;;  %v320_v49 = vrot.slane %v319_v47, 4 }
 0x422   :  { %v351_v50 = vadd.f32 %v350_v48, %v349_v46  ;;  %v321_v51 = vadd.f32 %v320_v49, %v319_v47 }
 0x423   :  { %v339_v52 = vpop.xlane.xlu1 %338 }
 0x424   :  { %v352_v55 = vrot.slane %v351_v50, 2  ;;  %v322_v56 = vrot.slane %v321_v51, 2  ;;  %v340_v57 = vrot.slane %v339_v52, 4 }
 0x426   :  { %v341_v58 = vadd.f32 %v340_v57, %v339_v52  ;;  %v323_v14 = vadd.f32 %v322_v56, %v321_v51  ;;  %v353_v59 = vadd.f32 %v352_v55, %v351_v50 }
 0x427   :  { %v380_v6 = vpop.xlane.xlu1 %379 }
 0x428   :  { %v342_v61 = vrot.slane %v341_v58, 2  ;;  %v324_v62 = vrot.slane %v323_v14, 1  ;;  %v354_v32 = vrot.slane %v353_v59, 1  ;;  %v381_v7 = vrot.slane %v380_v6, 4 }
 0x42a   :  { %v325_v63 = vadd.f32 %v324_v62, %v323_v14  ;;  %v343_v0 = vadd.f32 %v342_v61, %v341_v58  ;;  %v355_v4 = vadd.f32 %v354_v32, %v353_v59  ;;  %v382_v8 = vadd.f32 %v381_v7, %v380_v6 }
 0x42c   :  { %432 = vpush %v325_v63  ;;  %v344_v2 = vrot.slane %v343_v0, 1  ;;  %v383_v9 = vrot.slane %v382_v8, 2 }
 0x42d   :  { %434 = vpush %v335_v1 }
 0x42e   :  { %v345_v3 = vadd.f32 %v344_v2, %v343_v0  ;;  %v384_v11 = vadd.f32 %v383_v9, %v382_v8 }
 0x430   :  { %436 = vpush %v345_v3  ;;  %v385_v12 = vrot.slane %v384_v11, 1 }
 0x431   :  { %438 = vpush %v355_v4 }
 0x432   :  { %440 = vpush %v458_v5  ;;  %v386_v15 = vadd.f32 %v385_v12, %v384_v11 }
 0x45d   :  { %s433_s13 = spop %432 }
 0x45e   :  { %s435_s14 = spop %434  ;;  %s366_s19 = smul.f32 %s433_s13, %s433_s13 }
 0x45f   :  { %s360_s2 = smul.f32 %s433_s13, %s431_s12 }
 0x461   :  { %s437_s15 = spop %436 }
 0x462   :  { %s439_s16 = spop %438 }
 0x463   :  { %s441_s18 = spop %440 }
 0x464   :  { %s364_s20 = smul.f32 %s441_s18, %s363_s17 }
 0x465   :  { %s367_s21 = smul.f32 %s441_s18, %s366_s19 }
 0x466   :  { %s365_s22 = ssub.f32 %s435_s14, %s364_s20  ;;  %s361_s24 = smul.f32 %s441_s18, %s360_s2 }
 0x467   :  { %s368_s23 = ssub.f32 %s437_s15, %s367_s21 }
 0x468   :  { %s362_s0 = ssub.f32 %s439_s16, %s361_s24 }
 0x469   :  { %s370_s1 = smul.f32 %s368_s23, %s365_s22 }
 0x46a   :  { %s369_s25 = sand.u32 2147483647, %s362_s0 }
 0x46b   :  { %v371_v10 = vstv %s370_s1 }
 0x46c   :  { %459 = vrsqrt.f32 %v371_v10 }
 0x476   :  { %v460_v13 = vpop.eup %459 }
 0x477   :  { %442 = vpush %v460_v13 }
 0x478   :  { %444 = vpush %v386_v15 }
 0x4a8   :  { %s443_s26 = spop %442 }
 0x4a9   :  { %s374_s27 = smul.f32 %s443_s26, %s369_s25  ;;  %s445_s28 = spop %444 }
 0x4aa   :  { %s388_s29 = smul.f32 0.0009765625, %s445_s28 }
 0x4ab   :  { %s392_s30 = smul.f32 0.2, %s374_s27 }
 0x4ac   :  { %s394_s8 = smul.f32 0.2, %s388_s29 }
 0x4ad   :  { %s393_s7 = sadd.f32 %s392_s30, %s680_s5 }
 0x4af   :  { %s395_s9 = sadd.f32 %s394_s8, %s393_s7 }
 0x4b1   :  { %v396_v16 = vstv %s395_s9 }
 0x4b2   :  { %398 = vst.msk [vmem:[#allocation2] sm:$0x1] %vm397_vm7, %v396_v16 }
 0x4b3   :  { %472 = shalt.err (!%p469_p4)
}
 0x4b4   :  { %s473_s14 = scalar_lea.hbm %s707_s3, 16 }
 0x4b5   :  { %p474_p5 = scmp.ne.s32.totalorder %s707_s3, %s473_s14  ;;  %p477_p6 = scmp.lt.u32.totalorder %s473_s14, %s707_s3 }
 0x4b7   :  { %p479_p7 = pnand %p477_p6, %p474_p5 }
 0x4b9   :  { %482 = shalt.err (!%p479_p7)
}
 0x4ba   :  { %408 = dma.vmem_to_hbm [thread:$0]  %s406_s6, 16, %s707_s3, [#allocation3]  }
 0x4bb   :  { %483 = dma.done.wait [#allocation3], 16  }
 0x4bc   :  { %484 = vsyncadd [#allocation3], 4294967280 }
 0x4bd   :  { %412 = vsyncpa [#allocation3], 1 }

</bundles_post_ra>
